<compile_context>
chip_gen: v7x
topology: tpu7x:2x2x1
jax: 0.10.0
libtpu: 0.0.40
codegen_flags: <defaults>
</compile_context>

<pallas_src>
import functools

import jax
import jax.numpy as jnp
from jax.experimental import pallas as pl
from jax.experimental.pallas import tpu as pltpu


def _linear_private_kernel(x_ref, w_ref, scale_ref, bias_ref, o_ref):
    # x_ref    : (tr, G*i)  rows of x (G consecutive H positions folded into the lane dim)
    # w_ref    : (G*i, G*o) block-diagonal weight = kron(I_G, W.T)  (resident, constant map)
    # scale_ref: (tr, 1)    f32 per-row scale  (= scale[channel of that row])
    # bias_ref : (tr, 1)    f32 per-row bias
    # o_ref    : (tr, G*o)  f32 output rows
    y = jnp.dot(x_ref[...], w_ref[...], preferred_element_type=jnp.float32)
    o_ref[...] = (y * scale_ref[...] + bias_ref[...]).astype(o_ref.dtype)


def _pad128(d):
    return ((d + 127) // 128) * 128


def _pad8(d):
    return ((d + 7) // 8) * 8


@functools.partial(jax.jit, static_argnames=("block_rows",))
def linear_private_block(x, weight, scale, bias, *, block_rows=8192):
    """x: (N, C, H, i); weight: (o, i); scale, bias: (o,).  Requires C == o."""
    N, C, H, d_in = x.shape
    d_out = weight.shape[0]
    assert weight.shape == (d_out, d_in)
    assert C == d_out, "broadcast in forward() requires x.shape[1] == out_features"

    # ---- H-fold factor G (lane densification of the d_out=16-style outputs) -------------
    G = 1
    if d_out % 128 != 0:                       # already lane-dense -> nothing to gain
        for g in (8, 4, 2):
            if H % g == 0 and g * d_out <= 512 and (g * d_in) * (g * d_out) * 4 <= (4 << 20):
                G = g
                break
    Hg = H // G
    gdi, gdo = G * d_in, G * d_out
    R = N * C * Hg                              # total number of matmul rows

    # ---- free layout plumbing (bit-identical HBM layouts; no extra pass over x) ----------
    x_rows = x.reshape(R, gdi)
    # Block-diagonal weight: y_rows = x_rows @ kron(I_G, W.T)
    w_bd = jnp.kron(jnp.eye(G, dtype=jnp.float32),
                    jnp.transpose(weight).astype(jnp.float32)).astype(x.dtype)
    # Per-row scale/bias: every row r belongs to exactly one channel c -> scale[c], bias[c].
    scale_rows = jnp.broadcast_to(scale.astype(jnp.float32).reshape(1, C, 1),
                                  (N, C, Hg)).reshape(R, 1)
    bias_rows = jnp.broadcast_to(bias.astype(jnp.float32).reshape(1, C, 1),
                                 (N, C, Hg)).reshape(R, 1)

    # ---- generation-aware tile sizing from PADDED VMEM footprints ------------------------
    try:
        phys_vmem = int(pltpu.get_tpu_info().vmem_capacity_bytes)
    except Exception:
        phys_vmem = 64 << 20                    # most conservative (v7x per-TensorCore)
    phys_vmem = max(32 << 20, min(phys_vmem, 128 << 20))

    x_item = jnp.dtype(x.dtype).itemsize
    # Double-buffered, lane-padded bytes that ONE row of the streamed operands occupies
    # in VMEM: x tile + f32 out tile + (tr,1) scale + (tr,1) bias (each pads 1 -> 128 lanes).
    per_row = 2 * (_pad128(gdi) * x_item + _pad128(gdo) * 4 + 2 * 128 * 4)
    tile_budget = min(phys_vmem // 3, 40 << 20)          # plenty of headroom, v7x-safe
    tr = max(8, min(block_rows, (tile_budget // per_row) // 8 * 8))
    if R <= tr:
        tr = R                                  # single block: full extent is always legal
    num_blocks = pl.cdiv(R, tr)

    w_bytes = _pad8(gdi) * _pad128(gdo) * 4 * 2           # resident weight (budget 2 bufs)
    total_padded = _pad8(tr) * per_row + w_bytes
    vmem_limit = max(16 << 20,
                     min(int(total_padded * 1.25) + (1 << 20), (phys_vmem * 3) // 4))

    out_rows = pl.pallas_call(
        _linear_private_kernel,
        out_shape=jax.ShapeDtypeStruct((R, gdo), jnp.float32),
        grid=(num_blocks,),
        in_specs=[
            pl.BlockSpec((tr, gdi), lambda i: (i, 0)),       # x rows, streamed
            pl.BlockSpec((gdi, gdo), lambda i: (0, 0)),      # weight, resident
            pl.BlockSpec((tr, 1), lambda i: (i, 0)),         # per-row scale
            pl.BlockSpec((tr, 1), lambda i: (i, 0)),         # per-row bias
        ],
        out_specs=pl.BlockSpec((tr, gdo), lambda i: (i, 0)),
        compiler_params=pltpu.CompilerParams(
            dimension_semantics=("parallel",),   # >=2 steps at real sizes -> v7x megacore
            vmem_limit_bytes=vmem_limit,
        ),
    )(x_rows, w_bd, scale_rows, bias_rows)

    # (R, G*o) is bit-identical to (N, C, H, o) in HBM -> free reshape back.
    return out_rows.reshape(N, C, H, d_out)


def _reference(x, weight, scale, bias):
    y = jnp.einsum("nchi,oi->ncho", x, weight, precision=jax.lax.Precision.HIGHEST)
    return y * scale[None, :, None, None] + bias[None, :, None, None]


if __name__ == "__main__":
    # Small shapes consistent with the module's forward: x is (N, C, H, i) with
    # C == out_features so the (1, o, 1, 1) broadcast is valid.
    N, H = 2, 8
    in_features, out_features = 32, 16
    C = out_features

    key = jax.random.PRNGKey(0)
    kx, kw, ks, kb, kx2 = jax.random.split(key, 5)

    x = jax.random.normal(kx, (N, C, H, in_features), dtype=jnp.float32)
    bound = 1.0 / (in_features ** 0.5)
    weight = jax.random.uniform(
        kw, (out_features, in_features), minval=-bound, maxval=bound, dtype=jnp.float32
    )

    # Tolerance covers possible bf16-pass MXU rounding of the f32 matmul; O(1) outputs, so
    # any real indexing/weight bug would still blow well past it.
    TOL = dict(atol=5e-2, rtol=5e-2)

    # Case 1: module __init__ values (scale=1, bias=0).
    scale0 = jnp.ones((out_features,), dtype=jnp.float32)
    bias0 = jnp.zeros((out_features,), dtype=jnp.float32)
    out0 = jax.block_until_ready(linear_private_block(x, weight, scale0, bias0))
    ref0 = _reference(x, weight, scale0, bias0)
    assert out0.shape == (N, C, H, out_features)
    assert jnp.allclose(out0, ref0, **TOL)

    # Case 2: non-trivial per-channel scale/bias (exercises the channel indexing).
    scale1 = jax.random.normal(ks, (out_features,), dtype=jnp.float32)
    bias1 = jax.random.normal(kb, (out_features,), dtype=jnp.float32)
    out1 = jax.block_until_ready(linear_private_block(x, weight, scale1, bias1))
    ref1 = _reference(x, weight, scale1, bias1)
    assert jnp.allclose(out1, ref1, **TOL)

    # Case 3: H not divisible by 8 -> exercises the G=1 (no H-fold) fallback path.
    x2 = jax.random.normal(kx2, (N, C, 5, in_features), dtype=jnp.float32)
    out2 = jax.block_until_ready(linear_private_block(x2, weight, scale1, bias1))
    ref2 = _reference(x2, weight, scale1, bias1)
    assert out2.shape == (N, C, 5, out_features)
    assert jnp.allclose(out2, ref2, **TOL)

    print("KERNEL_OK")
</pallas_src>

<mosaic_0001>
module attributes {stable_mosaic.version = 11 : i64} {
  func.func @_linear_private_kernel(%arg0: i32, %arg1: memref<32x256xf32, #tpu.memory_space<vmem>>, %arg2: memref<256x128xf32, #tpu.memory_space<vmem>>, %arg3: memref<32x1xf32, #tpu.memory_space<vmem>>, %arg4: memref<32x1xf32, #tpu.memory_space<vmem>>, %arg5: memref<32x128xf32, #tpu.memory_space<vmem>>) attributes {dimension_semantics = [#tpu.dimension_semantics<parallel>], iteration_bounds = array<i64: 1>, scalar_prefetch = 0 : i64, scratch_operands = 0 : i64, tpu.core_type = #tpu.core_type<tc>, window_params = [{transform_indices = @transform_0, window_bounds = array<i64: 32, 256>}, {pipeline_mode = #tpu.pipeline_mode<synchronous>, transform_indices = @transform_1, window_bounds = array<i64: 256, 128>}, {transform_indices = @transform_2, window_bounds = array<i64: 32, 1>}, {transform_indices = @transform_3, window_bounds = array<i64: 32, 1>}, {transform_indices = @transform_4, window_bounds = array<i64: 32, 128>}]} {
    %c0 = arith.constant 0 : index
    %c0_0 = arith.constant 0 : index
    %0 = vector.load %arg1[%c0, %c0_0] : memref<32x256xf32, #tpu.memory_space<vmem>>, vector<32x256xf32>
    %c0_1 = arith.constant 0 : index
    %c0_2 = arith.constant 0 : index
    %1 = vector.load %arg2[%c0_1, %c0_2] : memref<256x128xf32, #tpu.memory_space<vmem>>, vector<256x128xf32>
    %cst = arith.constant dense<0.000000e+00> : vector<32x128xf32>
    %2 = tpu.matmul %0, %1, %cst {dimension_numbers = #tpu.dot_dimension_numbers<[1], [0], [0], [1], [0, 0, 1, 1], [], []>} : vector<32x256xf32>, vector<256x128xf32>, vector<32x128xf32> -> vector<32x128xf32>
    %c0_3 = arith.constant 0 : index
    %c0_4 = arith.constant 0 : index
    %3 = vector.load %arg3[%c0_3, %c0_4] : memref<32x1xf32, #tpu.memory_space<vmem>>, vector<32x1xf32>
    %4 = vector.broadcast %3 : vector<32x1xf32> to vector<32x128xf32>
    %5 = arith.mulf %2, %4 : vector<32x128xf32>
    %c0_5 = arith.constant 0 : index
    %c0_6 = arith.constant 0 : index
    %6 = vector.load %arg4[%c0_5, %c0_6] : memref<32x1xf32, #tpu.memory_space<vmem>>, vector<32x1xf32>
    %7 = vector.broadcast %6 : vector<32x1xf32> to vector<32x128xf32>
    %8 = arith.addf %5, %7 : vector<32x128xf32>
    %c0_7 = arith.constant 0 : index
    %c0_8 = arith.constant 0 : index
    %9 = vector.load %arg5[%c0_7, %c0_8] : memref<32x128xf32, #tpu.memory_space<vmem>>, vector<32x128xf32>
    tpu.vector_store %arg5[%c0_7, %c0_8], %8 {strides = array<i32>} : memref<32x128xf32, #tpu.memory_space<vmem>>, vector<32x128xf32>,
    return
  }
  func.func @transform_0(%arg0: i32) -> (i32, i32) {
    %c0_i32 = arith.constant 0 : i32
    %c0_i32_0 = arith.constant 0 : i32
    return %arg0, %c0_i32 : i32, i32
  }
  func.func @transform_1(%arg0: i32) -> (i32, i32) {
    %c0_i32 = arith.constant 0 : i32
    %c0_i32_0 = arith.constant 0 : i32
    %c0_i32_1 = arith.constant 0 : i32
    return %c0_i32, %c0_i32_0 : i32, i32
  }
  func.func @transform_2(%arg0: i32) -> (i32, i32) {
    %c0_i32 = arith.constant 0 : i32
    %c0_i32_0 = arith.constant 0 : i32
    return %arg0, %c0_i32 : i32, i32
  }
  func.func @transform_3(%arg0: i32) -> (i32, i32) {
    %c0_i32 = arith.constant 0 : i32
    %c0_i32_0 = arith.constant 0 : i32
    return %arg0, %c0_i32 : i32, i32
  }
  func.func @transform_4(%arg0: i32) -> (i32, i32) {
    %c0_i32 = arith.constant 0 : i32
    %c0_i32_0 = arith.constant 0 : i32
    return %arg0, %c0_i32 : i32, i32
  }
}

</mosaic_0001>

<bundles_post_ra>
// kernel: linear_private_block.1
= control target key start
LH: loop header
LB: loop body
LE: loop exit
PB: predicated region body
PF: predicated region fallthrough
CT: control target
= control target key end

     0   :  { %v301_v3 = vmov 0   ;;  %s483_s1 = inlined_call_operand.vmem [shape: f32[256,128], index: 1, kind: input, shape index: {}]   ;;  %s484_s0 = inlined_call_operand.vmem [shape: f32[32,256], index: 0, kind: input, shape index: {}]   ;;  %s485_s2 = inlined_call_operand.vmem [shape: f32[32,1], index: 2, kind: input, shape index: {}]   ;;  %s486_s3 = inlined_call_operand.vmem [shape: f32[32,1], index: 3, kind: input, shape index: {}]   ;;  %s487_s4 = inlined_call_operand.vmem [shape: f32[32,128], index: 4, kind: output, shape index: {}]  }
   0x1   :  { %v41_v0 = vld [vmem:[%s483_s1 + $0x80] sm:$0xff]  ;;  %v42_v1 = vld [vmem:[%s483_s1 + $0x88] sm:$0xff]  ;;  %300 = vset.pattern.permute.xlu1 %v301_v3  ;;  %299 = vset.pattern.permute.xlu0 %v301_v3  ;;  %v43_v6 = vld [vmem:[%s483_s1 + $0x90] sm:$0xff] }
   0x2   :  { %v25_v2 = vld [vmem:[%s483_s1] sm:$0xff]  ;;  %v250_v4 = vpack.c.bf16 %v42_v1, %v41_v0  ;;  %v26_v5 = vld [vmem:[%s483_s1 + $0x8] sm:$0xff]  ;;  %v44_v7 = vld [vmem:[%s483_s1 + $0x98] sm:$0xff] }
   0x3   :  { %v252_v8 = vpack.c.bf16 %v26_v5, %v25_v2  ;;  %v254_v9 = vpack.c.bf16 %v44_v7, %v43_v6  ;;  %v27_v10 = vld [vmem:[%s483_s1 + $0x10] sm:$0xff]  ;;  %v28_v11 = vld [vmem:[%s483_s1 + $0x18] sm:$0xff]  ;;  %v45_v12 = vld [vmem:[%s483_s1 + $0xa0] sm:$0xff] }
   0x4   :  { %251 = vmatprep.subr.bf16.mxu0 %v250_v4  ;;  %282 = vmatprep.subr.bf16.mxu1 %v250_v4  ;;  %v46_v13 = vld [vmem:[%s483_s1 + $0xa8] sm:$0xff]  ;;  %v256_v14 = vpack.c.bf16 %v28_v11, %v27_v10  ;;  %v29_v16 = vld [vmem:[%s483_s1 + $0x20] sm:$0xff]  ;;  %v47_v18 = vld [vmem:[%s483_s1 + $0xb0] sm:$0xff] }
   0x5   :  { %253 = vmatpush3.bf16.msra.mxu0 %v252_v8  ;;  %290 = vmatpush3.bf16.msra.mxu1 %v252_v8  ;;  %v258_v15 = vpack.c.bf16 %v46_v13, %v45_v12  ;;  %v30_v17 = vld [vmem:[%s483_s1 + $0x28] sm:$0xff]  ;;  %v48_v19 = vld [vmem:[%s483_s1 + $0xb8] sm:$0xff]  ;;  %v31_v22 = vld [vmem:[%s483_s1 + $0x30] sm:$0xff] }
   0x6   :  { %255 = vmatprep.subr.bf16.mxu0 %v254_v9  ;;  %283 = vmatprep.subr.bf16.mxu1 %v254_v9  ;;  %v260_v20 = vpack.c.bf16 %v30_v17, %v29_v16  ;;  %v262_v21 = vpack.c.bf16 %v48_v19, %v47_v18  ;;  %v32_v23 = vld [vmem:[%s483_s1 + $0x38] sm:$0xff]  ;;  %v49_v24 = vld [vmem:[%s483_s1 + $0xc0] sm:$0xff]  ;;  %v50_v25 = vld [vmem:[%s483_s1 + $0xc8] sm:$0xff] }
   0x7   :  { %v18_v26 = vld [vmem:[%s484_s0 + $0x8] sm:$0xff]  ;;  %v264_v28 = vpack.c.bf16 %v32_v23, %v31_v22  ;;  %v33_v29 = vld [vmem:[%s483_s1 + $0x40] sm:$0xff]  ;;  %v266_v30 = vpack.c.bf16 %v50_v25, %v49_v24  ;;  %v144_v32 = vld [vmem:[%s485_s2 + $0x10] sm:$0xff] }
   0x8   :  { %121 = vmatprep.mubr.f32.mxu0 %v18_v26  ;;  %v22_v27 = vld [vmem:[%s484_s0 + $0x28] sm:$0xff]  ;;  %v142_v33 = vld [vmem:[%s485_s2] sm:$0xff]  ;;  %v51_v34 = vld [vmem:[%s483_s1 + $0xd0] sm:$0xff]  ;;  %158 = vperm.xlu1 %300, %v144_v32  }
   0x9   :  { %257 = vmatpush3.bf16.msra.mxu0 %v256_v14  ;;  %291 = vmatpush3.bf16.msra.mxu1 %v256_v14  ;;  %v34_v31 = vld [vmem:[%s483_s1 + $0x48] sm:$0xff]  ;;  %v52_v35 = vld [vmem:[%s483_s1 + $0xd8] sm:$0xff]  ;;  %v35_v40 = vld [vmem:[%s483_s1 + $0x50] sm:$0xff] }
   0xa   :  { %259 = vmatprep.subr.bf16.mxu0 %v258_v15  ;;  %284 = vmatprep.subr.bf16.mxu1 %v258_v15  ;;  %v145_v36 = vld [vmem:[%s485_s2 + $0x18] sm:$0xff]  ;;  %v268_v37 = vpack.c.bf16 %v34_v31, %v33_v29  ;;  %v143_v38 = vld [vmem:[%s485_s2 + $0x8] sm:$0xff]  ;;  %v270_v39 = vpack.c.bf16 %v52_v35, %v51_v34  ;;  %v53_v42 = vld [vmem:[%s483_s1 + $0xe0] sm:$0xff] }
   0xb   :  { %131 = vmatprep.mubr.f32.mxu1 %v22_v27  ;;  %148 = vperm.xlu0 %299, %v142_v33   ;;  %v36_v41 = vld [vmem:[%s483_s1 + $0x58] sm:$0xff]  ;;  %v54_v43 = vld [vmem:[%s483_s1 + $0xe8] sm:$0xff]  ;;  %v170_v46 = vld [vmem:[%s486_s3] sm:$0xff] }
   0xc   :  { %163 = vperm.xlu1 %300, %v145_v36   ;;  %v171_v44 = vld [vmem:[%s486_s3 + $0x8] sm:$0xff]  ;;  %v272_v45 = vpack.c.bf16 %v36_v41, %v35_v40  ;;  %v274_v47 = vpack.c.bf16 %v54_v43, %v53_v42  ;;  %v37_v48 = vld [vmem:[%s483_s1 + $0x60] sm:$0xff]  ;;  %v55_v50 = vld [vmem:[%s483_s1 + $0xf0] sm:$0xff] }
   0xd   :  { %261 = vmatpush3.bf16.msra.mxu0 %v260_v20  ;;  %292 = vmatpush3.bf16.msra.mxu1 %v260_v20  ;;  %v38_v49 = vld [vmem:[%s483_s1 + $0x68] sm:$0xff]  ;;  %v56_v51 = vld [vmem:[%s483_s1 + $0xf8] sm:$0xff]  ;;  %v172_v54 = vld [vmem:[%s486_s3 + $0x10] sm:$0xff] }
   0xe   :  { %263 = vmatprep.subr.bf16.mxu0 %v262_v21  ;;  %285 = vmatprep.subr.bf16.mxu1 %v262_v21  ;;  %v173_v52 = vld [vmem:[%s486_s3 + $0x18] sm:$0xff]  ;;  %v276_v53 = vpack.c.bf16 %v38_v49, %v37_v48  ;;  %v278_v55 = vpack.c.bf16 %v56_v51, %v55_v50  ;;  %v39_v56 = vld [vmem:[%s483_s1 + $0x70] sm:$0xff]  ;;  %v17_v59 = vld [vmem:[%s484_s0] sm:$0xff] }
   0xf   :  { %153 = vperm.xlu0 %299, %v143_v38   ;;  %v40_v57 = vld [vmem:[%s483_s1 + $0x78] sm:$0xff]  ;;  %v21_v60 = vld [vmem:[%s484_s0 + $0x20] sm:$0xff]  ;;  %v19_v63 = vld [vmem:[%s484_s0 + $0x10] sm:$0xff] }
  0x10   :  { %181 = vperm.xlu1 %300, %v171_v44   ;;  %v280_v58 = vpack.c.bf16 %v40_v57, %v39_v56  ;;  %v20_v61 = vld [vmem:[%s484_s0 + $0x18] sm:$0xff]  ;;  %v23_v0 = vld [vmem:[%s484_s0 + $0x30] sm:$0xff] }
  0x11   :  { %265 = vmatpush3.bf16.msra.mxu0 %v264_v28  ;;  %293 = vmatpush3.bf16.msra.mxu1 %v264_v28  ;;  %v24_v62 = vld [vmem:[%s484_s0 + $0x38] sm:$0xff] }
  0x12   :  { %267 = vmatprep.subr.bf16.mxu0 %v266_v30  ;;  %286 = vmatprep.subr.bf16.mxu1 %v266_v30 }
  0x13   :  { %176 = vperm.xlu0 %299, %v170_v46  }
  0x14   :  { %191 = vperm.xlu1 %300, %v173_v52  }
  0x15   :  { %269 = vmatpush3.bf16.msra.mxu0 %v268_v37  ;;  %294 = vmatpush3.bf16.msra.mxu1 %v268_v37 }
  0x16   :  { %271 = vmatprep.subr.bf16.mxu0 %v270_v39  ;;  %287 = vmatprep.subr.bf16.mxu1 %v270_v39 }
  0x17   :  { %186 = vperm.xlu0 %299, %v172_v54  }
  0x19   :  { %273 = vmatpush3.bf16.msra.mxu0 %v272_v45  ;;  %295 = vmatpush3.bf16.msra.mxu1 %v272_v45 }
  0x1a   :  { %275 = vmatprep.subr.bf16.mxu0 %v274_v47  ;;  %288 = vmatprep.subr.bf16.mxu1 %v274_v47 }
  0x1d   :  { %277 = vmatpush3.bf16.msra.mxu0 %v276_v53  ;;  %296 = vmatpush3.bf16.msra.mxu1 %v276_v53 }
  0x1e   :  { %279 = vmatprep.subr.bf16.mxu0 %v278_v55  ;;  %289 = vmatprep.subr.bf16.mxu1 %v278_v55 }
  0x21   :  { %281 = vmatpush3.bf16.msra.mxu0 %v280_v58  ;;  %297 = vmatpush3.bf16.msra.mxu1 %v280_v58 }
  0x24   :  { %122 = vmatmul.mubr.f32.vlgmr.msra.gmra.mrb[0].mxu0 %v17_v59  ;;  %132 = vmatmul.mubr.f32.vlgmr.msra.gmra.mrb[0].mxu1 %v21_v60 }
  0x25   :  { %126 = vmatprep.mubr.f32.mxu0 %v20_v61  ;;  %136 = vmatprep.mubr.f32.mxu1 %v24_v62 }
  0x28   :  { %127 = vmatmul.mubr.f32.gmra.mrb[2].mxu0 %v19_v63  ;;  %137 = vmatmul.mubr.f32.gmra.mrb[2].mxu1 %v23_v0 }
  0x87   :  { %v159_v2 = vpop.permute.xlu1 %158 }
  0x8a   :  { %v149_v1 = vpop.permute.xlu0 %148 }
  0x8b   :  { %v164_v4 = vpop.permute.xlu1 %163 }
  0x8e   :  { %v154_v3 = vpop.permute.xlu0 %153 }
  0x8f   :  { %v182_v12 = vpop.permute.xlu1 %181 }
  0x92   :  { %v177_v5 = vpop.permute.xlu0 %176 }
  0x93   :  { %v192_v26 = vpop.permute.xlu1 %191 }
  0x96   :  { %v187_v13 = vpop.permute.xlu0 %186 }
  0xf7   :  { %v238_v6 = vpop.f32.mrb[0].mxu0  ;;  %v244_v7 = vpop.f32.mrb[0].mxu1 }
  0xf8   :  { %v239_v8 = vpop.f32.mrb[1].mxu0  ;;  %v245_v9 = vpop.f32.mrb[1].mxu1 }
  0xf9   :  { %v240_v10 = vadd.f32 %v239_v8, %v238_v6  ;;  %v246_v11 = vadd.f32 %v245_v9, %v244_v7 }
  0xfb   :  { %v166_v14 = vmul.f32 %v240_v10, %v149_v1  ;;  %v168_v15 = vmul.f32 %v246_v11, %v159_v2  ;;  %v241_v16 = vpop.f32.mrb[2].mxu0  ;;  %v247_v17 = vpop.f32.mrb[2].mxu1 }
  0xfc   :  { %v242_v18 = vpop.f32.mrb[3].mxu0  ;;  %v248_v19 = vpop.f32.mrb[3].mxu1 }
  0xfd   :  { %v194_v20 = vadd.f32 %v177_v5, %v166_v14  ;;  %v196_v21 = vadd.f32 %v187_v13, %v168_v15  ;;  %v243_v22 = vadd.f32 %v242_v18, %v241_v16  ;;  %v249_v23 = vadd.f32 %v248_v19, %v247_v17 }
  0xff   :  { %198 = vst [vmem:[%s487_s4] sm:$0xff] %v194_v20  ;;  %200 = vst [vmem:[%s487_s4 + $0x10] sm:$0xff] %v196_v21  ;;  %v167_v24 = vmul.f32 %v243_v22, %v154_v3  ;;  %v169_v25 = vmul.f32 %v249_v23, %v164_v4 }
 0x101   :  { %v195_v27 = vadd.f32 %v182_v12, %v167_v24  ;;  %v197_v28 = vadd.f32 %v192_v26, %v169_v25 }
 0x103   :  { %199 = vst [vmem:[%s487_s4 + $0x8] sm:$0xff] %v195_v27  ;;  %201 = vst [vmem:[%s487_s4 + $0x18] sm:$0xff] %v197_v28 }

</bundles_post_ra>
